<compile_context>
chip_gen: v7x
topology: tpu7x:2x2x1
jax: 0.10.0
libtpu: 0.0.40
codegen_flags: <defaults>
</compile_context>

<pallas_src>
import functools
import math

import jax
import jax.numpy as jnp
from jax.experimental import pallas as pl
from jax.experimental.pallas import tpu as pltpu


# ---------------------------------------------------------------------------
# Kernel 1: gamma/beta = soft-clamped linear projections of cond (tiny, one block).
# ---------------------------------------------------------------------------
def _gamma_beta_kernel(cond_ref, wg_ref, bg_ref, wb_ref, bb_ref,
                       gamma_ref, beta_ref):
    cond = cond_ref[...]                                                   # (B, D)
    g = jnp.dot(cond, wg_ref[...], preferred_element_type=jnp.float32) + bg_ref[...]
    b = jnp.dot(cond, wb_ref[...], preferred_element_type=jnp.float32) + bb_ref[...]
    gamma_ref[...] = 300.0 * jnp.tanh(g * (1.0 / 300.0))                   # (B, C)
    beta_ref[...] = 300.0 * jnp.tanh(b * (1.0 / 300.0))                    # (B, C)


# ---------------------------------------------------------------------------
# Kernel 2: streaming FiLM modulation over lane-dense (B, Tf, Cf) tiles with
# fused per-tile |x| / |result| partial sums (no second pass over HBM).
# sg/sb already contain the `scale` factor.
# ---------------------------------------------------------------------------
def _film_tile_kernel(sg_ref, sb_ref, x_ref, out_ref, px_ref, pr_ref):
    sg = sg_ref[...]                               # (1, 1, Cf) f32 = scale*gamma
    sb = sb_ref[...]                               # (1, 1, Cf) f32 = scale*beta
    x = x_ref[...].astype(jnp.float32)             # (1, tT, Cf)
    result = sg * x + sb                           # broadcast over the tile's rows
    out_ref[...] = result.astype(out_ref.dtype)
    # Per-lane partial sums (sublane-only reduce on XLU; lanes kept -> dense store).
    px_ref[...] = jnp.sum(jnp.abs(x), axis=1, keepdims=True).reshape(px_ref.shape)
    pr_ref[...] = jnp.sum(jnp.abs(result), axis=1, keepdims=True).reshape(pr_ref.shape)


# ---------------------------------------------------------------------------
# Helpers
# ---------------------------------------------------------------------------
def _vmem_capacity_bytes():
    try:
        return int(pltpu.get_tpu_info().vmem_capacity_bytes)
    except Exception:
        return 64 * 1024 * 1024     # conservative (v7x-sized) fallback


def _pick_tile_rows(n_rows, row_bytes, target_bytes):
    """Largest divisor of n_rows that is a multiple of 8 and fits target_bytes."""
    cap = max(8, target_bytes // max(row_bytes, 1))
    if n_rows <= cap:
        return n_rows
    for d in range(int(min(cap, n_rows)), 7, -1):
        if n_rows % d == 0 and d % 8 == 0:
            return d
    return n_rows   # no aligned divisor: single block over T (still correct)


# ---------------------------------------------------------------------------
# Wrapper
# ---------------------------------------------------------------------------
@functools.partial(jax.jit, static_argnames=("block_bytes",))
def film_forward(x, cond, wg, bg, wb, bb, scale, *, block_bytes=None):
    B, T, C = x.shape
    itemsize = jnp.dtype(x.dtype).itemsize

    # ---- gamma/beta (hoisted out of the streaming loop) ----
    gamma, beta = pl.pallas_call(
        _gamma_beta_kernel,
        out_shape=(jax.ShapeDtypeStruct((B, C), jnp.float32),
                   jax.ShapeDtypeStruct((B, C), jnp.float32)),
        in_specs=[pl.BlockSpec(memory_space=pltpu.MemorySpace.VMEM)] * 5,
        out_specs=(pl.BlockSpec(memory_space=pltpu.MemorySpace.VMEM),
                   pl.BlockSpec(memory_space=pltpu.MemorySpace.VMEM)),
    )(cond, wg, bg, wb, bb)

    # ---- lane-dense layout: fold T rows into lanes when C is small ----
    if C < 128 and 128 % C == 0 and T % (128 // C) == 0:
        fold = 128 // C
    else:
        fold = 1        # C already lane-dense (or not foldable): masked stores accepted
    Tf, Cf = T // fold, C * fold
    xf = x.reshape(B, Tf, Cf)                                  # free (contiguous) view

    # Fold `scale` into the tiny (B, C) gamma/beta (fused by XLA; gamma/beta stay
    # unscaled for the min/max metrics).
    scale_f32 = jnp.asarray(scale, jnp.float32)
    sg = jnp.tile(scale_f32 * gamma, (1, fold)).reshape(B, 1, Cf)
    sb = jnp.tile(scale_f32 * beta, (1, fold)).reshape(B, 1, Cf)

    # ---- generation-aware tile size / VMEM budget ----
    vmem_cap = _vmem_capacity_bytes()
    if block_bytes is None:
        block_bytes = (8 * 1024 * 1024 if vmem_cap > 96 * 1024 * 1024
                       else 4 * 1024 * 1024)
    tT = _pick_tile_rows(Tf, Cf * itemsize, block_bytes)
    GT = Tf // tT
    block_vmem = tT * Cf * itemsize
    vmem_limit = min(int(vmem_cap * 3 // 4),
                     max(32 * 1024 * 1024, 4 * block_vmem + 8 * 1024 * 1024))

    out_f, px, pr = pl.pallas_call(
        _film_tile_kernel,
        grid=(B, GT),
        out_shape=(
            jax.ShapeDtypeStruct((B, Tf, Cf), x.dtype),
            jax.ShapeDtypeStruct((B, GT, 1, Cf), jnp.float32),   # per-tile sum|x|
            jax.ShapeDtypeStruct((B, GT, 1, Cf), jnp.float32),   # per-tile sum|out|
        ),
        in_specs=[
            pl.BlockSpec((1, 1, Cf), lambda b, t: (b, 0, 0)),         # scale*gamma
            pl.BlockSpec((1, 1, Cf), lambda b, t: (b, 0, 0)),         # scale*beta
            pl.BlockSpec((1, tT, Cf), lambda b, t: (b, t, 0)),        # x tile
        ],
        out_specs=(
            pl.BlockSpec((1, tT, Cf), lambda b, t: (b, t, 0)),        # result tile
            pl.BlockSpec((1, 1, 1, Cf), lambda b, t: (b, t, 0, 0)),   # partial |x|
            pl.BlockSpec((1, 1, 1, Cf), lambda b, t: (b, t, 0, 0)),   # partial |out|
        ),
        compiler_params=pltpu.CompilerParams(
            dimension_semantics=("parallel", "parallel"),
            vmem_limit_bytes=int(vmem_limit)),
        cost_estimate=pl.CostEstimate(
            flops=2 * B * T * C,
            transcendentals=0,
            bytes_accessed=2 * B * T * C * itemsize),
    )(sg, sb, xf)

    result = out_f.reshape(B, T, C)
    n = B * T * C
    metrics = jnp.stack([
        jnp.min(gamma), jnp.max(gamma), jnp.min(beta), jnp.max(beta),
        jnp.sum(px) / n, jnp.sum(pr) / n,
    ])
    return result, metrics


# ---------------------------------------------------------------------------
# Demo / self-check
# ---------------------------------------------------------------------------
if __name__ == "__main__":
    B, T, C, D = 2, 2048, 16, 32     # batch, seq, feature_channels, condition_dim
    init_scale = 0.05

    key = jax.random.PRNGKey(0)
    kx, kc, kwg, kbg, kwb, kbb = jax.random.split(key, 6)

    x = jax.random.normal(kx, (B, T, C), dtype=jnp.float32)
    cond = jax.random.normal(kc, (B, D), dtype=jnp.float32)

    # torch.nn.Linear-style U(-1/sqrt(D), 1/sqrt(D)) init; weights stored (D, C).
    bound = 1.0 / math.sqrt(D)
    wg = jax.random.uniform(kwg, (D, C), jnp.float32, -bound, bound)
    bg = jax.random.uniform(kbg, (1, C), jnp.float32, -bound, bound)
    wb = jax.random.uniform(kwb, (D, C), jnp.float32, -bound, bound)
    bb = jax.random.uniform(kbb, (1, C), jnp.float32, -bound, bound)
    scale = jnp.float32(init_scale)

    # Small block size so the demo exercises a multi-tile (B x T-tiles) grid.
    result, metrics = film_forward(x, cond, wg, bg, wb, bb, scale,
                                   block_bytes=32 * 1024)
    jax.block_until_ready((result, metrics))

    # Pure-JAX reference.
    gamma_ref = 300.0 * jnp.tanh((cond @ wg + bg) / 300.0)
    beta_ref = 300.0 * jnp.tanh((cond @ wb + bb) / 300.0)
    ref = init_scale * (gamma_ref[:, None, :] * x + beta_ref[:, None, :])
    ref_metrics = jnp.array(
        [gamma_ref.min(), gamma_ref.max(), beta_ref.min(), beta_ref.max(),
         jnp.abs(x).mean(), jnp.abs(ref).mean()], dtype=jnp.float32)

    assert jnp.allclose(result, ref, rtol=1e-5, atol=1e-5), "result mismatch"
    assert jnp.allclose(metrics, ref_metrics, rtol=2e-4, atol=1e-5), "metrics mismatch"

    text_metrics = {
        "film_gamma_min": float(metrics[0]),
        "film_gamma_max": float(metrics[1]),
        "film_beta_min": float(metrics[2]),
        "film_beta_max": float(metrics[3]),
        "film_input_magnitude": float(metrics[4]),
        "film_output_magnitude": float(metrics[5]),
    }
    del text_metrics  # same keys/semantics as the PyTorch module's dict return

    print("KERNEL_OK")
</pallas_src>

<mosaic_0001>
module attributes {stable_mosaic.version = 11 : i64} {
  func.func @_gamma_beta_kernel(%arg0: memref<2x32xf32, #tpu.memory_space<vmem>>, %arg1: memref<32x16xf32, #tpu.memory_space<vmem>>, %arg2: memref<1x16xf32, #tpu.memory_space<vmem>>, %arg3: memref<32x16xf32, #tpu.memory_space<vmem>>, %arg4: memref<1x16xf32, #tpu.memory_space<vmem>>, %arg5: memref<2x16xf32, #tpu.memory_space<vmem>>, %arg6: memref<2x16xf32, #tpu.memory_space<vmem>>) attributes {dimension_semantics = [], scalar_prefetch = 0 : i64, scratch_operands = 0 : i64, tpu.core_type = #tpu.core_type<tc>} {
    %c0 = arith.constant 0 : index
    %c0_0 = arith.constant 0 : index
    %0 = vector.load %arg0[%c0, %c0_0] : memref<2x32xf32, #tpu.memory_space<vmem>>, vector<2x32xf32>
    %c0_1 = arith.constant 0 : index
    %c0_2 = arith.constant 0 : index
    %1 = vector.load %arg1[%c0_1, %c0_2] : memref<32x16xf32, #tpu.memory_space<vmem>>, vector<32x16xf32>
    %cst = arith.constant dense<0.000000e+00> : vector<2x16xf32>
    %2 = tpu.matmul %0, %1, %cst {dimension_numbers = #tpu.dot_dimension_numbers<[1], [0], [0], [1], [0, 0, 1, 1], [], []>} : vector<2x32xf32>, vector<32x16xf32>, vector<2x16xf32> -> vector<2x16xf32>
    %c0_3 = arith.constant 0 : index
    %c0_4 = arith.constant 0 : index
    %3 = vector.load %arg2[%c0_3, %c0_4] : memref<1x16xf32, #tpu.memory_space<vmem>>, vector<1x16xf32>
    %4 = vector.broadcast %3 : vector<1x16xf32> to vector<2x16xf32>
    %5 = arith.addf %2, %4 : vector<2x16xf32>
    %c0_5 = arith.constant 0 : index
    %c0_6 = arith.constant 0 : index
    %6 = vector.load %arg3[%c0_5, %c0_6] : memref<32x16xf32, #tpu.memory_space<vmem>>, vector<32x16xf32>
    %cst_7 = arith.constant dense<0.000000e+00> : vector<2x16xf32>
    %7 = tpu.matmul %0, %6, %cst_7 {dimension_numbers = #tpu.dot_dimension_numbers<[1], [0], [0], [1], [0, 0, 1, 1], [], []>} : vector<2x32xf32>, vector<32x16xf32>, vector<2x16xf32> -> vector<2x16xf32>
    %c0_8 = arith.constant 0 : index
    %c0_9 = arith.constant 0 : index
    %8 = vector.load %arg4[%c0_8, %c0_9] : memref<1x16xf32, #tpu.memory_space<vmem>>, vector<1x16xf32>
    %9 = vector.broadcast %8 : vector<1x16xf32> to vector<2x16xf32>
    %10 = arith.addf %7, %9 : vector<2x16xf32>
    %cst_10 = arith.constant 0.00333333341 : f32
    %11 = vector.broadcast %cst_10 : f32 to vector<2x16xf32>
    %12 = arith.mulf %5, %11 : vector<2x16xf32>
    %13 = math.tanh %12 : vector<2x16xf32>
    %cst_11 = arith.constant 3.000000e+02 : f32
    %14 = vector.broadcast %cst_11 : f32 to vector<2x16xf32>
    %15 = arith.mulf %14, %13 : vector<2x16xf32>
    %c0_12 = arith.constant 0 : index
    %c0_13 = arith.constant 0 : index
    %16 = vector.load %arg5[%c0_12, %c0_13] : memref<2x16xf32, #tpu.memory_space<vmem>>, vector<2x16xf32>
    tpu.vector_store %arg5[%c0_12, %c0_13], %15 {strides = array<i32>} : memref<2x16xf32, #tpu.memory_space<vmem>>, vector<2x16xf32>,
    %cst_14 = arith.constant 0.00333333341 : f32
    %17 = vector.broadcast %cst_14 : f32 to vector<2x16xf32>
    %18 = arith.mulf %10, %17 : vector<2x16xf32>
    %19 = math.tanh %18 : vector<2x16xf32>
    %cst_15 = arith.constant 3.000000e+02 : f32
    %20 = vector.broadcast %cst_15 : f32 to vector<2x16xf32>
    %21 = arith.mulf %20, %19 : vector<2x16xf32>
    %c0_16 = arith.constant 0 : index
    %c0_17 = arith.constant 0 : index
    %22 = vector.load %arg6[%c0_16, %c0_17] : memref<2x16xf32, #tpu.memory_space<vmem>>, vector<2x16xf32>
    tpu.vector_store %arg6[%c0_16, %c0_17], %21 {strides = array<i32>} : memref<2x16xf32, #tpu.memory_space<vmem>>, vector<2x16xf32>,
    return
  }
}

module attributes {stable_mosaic.version = 11 : i64} {
  func.func @_film_tile_kernel(%arg0: i32, %arg1: i32, %arg2: memref<1x1x128xf32, #tpu.memory_space<vmem>>, %arg3: memref<1x1x128xf32, #tpu.memory_space<vmem>>, %arg4: memref<1x64x128xf32, #tpu.memory_space<vmem>>, %arg5: memref<1x64x128xf32, #tpu.memory_space<vmem>>, %arg6: memref<1x1x1x128xf32, #tpu.memory_space<vmem>>, %arg7: memref<1x1x1x128xf32, #tpu.memory_space<vmem>>) attributes {dimension_semantics = [#tpu.dimension_semantics<parallel>, #tpu.dimension_semantics<parallel>], iteration_bounds = array<i64: 2, 4>, scalar_prefetch = 0 : i64, scratch_operands = 0 : i64, tpu.core_type = #tpu.core_type<tc>, window_params = [{transform_indices = @transform_0, window_bounds = array<i64: 1, 1, 128>}, {transform_indices = @transform_1, window_bounds = array<i64: 1, 1, 128>}, {transform_indices = @transform_2, window_bounds = array<i64: 1, 64, 128>}, {transform_indices = @transform_3, window_bounds = array<i64: 1, 64, 128>}, {transform_indices = @transform_4, window_bounds = array<i64: 1, 1, 1, 128>}, {transform_indices = @transform_5, window_bounds = array<i64: 1, 1, 1, 128>}]} {
    %c0 = arith.constant 0 : index
    %c0_0 = arith.constant 0 : index
    %c0_1 = arith.constant 0 : index
    %0 = vector.load %arg2[%c0, %c0_0, %c0_1] : memref<1x1x128xf32, #tpu.memory_space<vmem>>, vector<1x1x128xf32>
    %c0_2 = arith.constant 0 : index
    %c0_3 = arith.constant 0 : index
    %c0_4 = arith.constant 0 : index
    %1 = vector.load %arg3[%c0_2, %c0_3, %c0_4] : memref<1x1x128xf32, #tpu.memory_space<vmem>>, vector<1x1x128xf32>
    %c0_5 = arith.constant 0 : index
    %c0_6 = arith.constant 0 : index
    %c0_7 = arith.constant 0 : index
    %2 = vector.load %arg4[%c0_5, %c0_6, %c0_7] : memref<1x64x128xf32, #tpu.memory_space<vmem>>, vector<1x64x128xf32>
    %3 = vector.broadcast %0 : vector<1x1x128xf32> to vector<1x64x128xf32>
    %4 = arith.mulf %3, %2 : vector<1x64x128xf32>
    %5 = vector.broadcast %1 : vector<1x1x128xf32> to vector<1x64x128xf32>
    %6 = arith.addf %4, %5 : vector<1x64x128xf32>
    %c0_8 = arith.constant 0 : index
    %c0_9 = arith.constant 0 : index
    %c0_10 = arith.constant 0 : index
    %7 = vector.load %arg5[%c0_8, %c0_9, %c0_10] : memref<1x64x128xf32, #tpu.memory_space<vmem>>, vector<1x64x128xf32>
    tpu.vector_store %arg5[%c0_8, %c0_9, %c0_10], %6 {strides = array<i32>} : memref<1x64x128xf32, #tpu.memory_space<vmem>>, vector<1x64x128xf32>,
    %8 = math.absf %2 : vector<1x64x128xf32>
    %cst = arith.constant dense<0.000000e+00> : vector<1x128xf32>
    %9 = vector.multi_reduction <add>, %8, %cst [1] : vector<1x64x128xf32> to vector<1x128xf32>
    %10 = vector.shape_cast %9 : vector<1x128xf32> to vector<1x1x128xf32>
    %11 = vector.shape_cast %10 : vector<1x1x128xf32> to vector<1x1x1x128xf32>
    %c0_11 = arith.constant 0 : index
    %c0_12 = arith.constant 0 : index
    %c0_13 = arith.constant 0 : index
    %c0_14 = arith.constant 0 : index
    %12 = vector.load %arg6[%c0_11, %c0_12, %c0_13, %c0_14] : memref<1x1x1x128xf32, #tpu.memory_space<vmem>>, vector<1x1x1x128xf32>
    tpu.vector_store %arg6[%c0_11, %c0_12, %c0_13, %c0_14], %11 {strides = array<i32>} : memref<1x1x1x128xf32, #tpu.memory_space<vmem>>, vector<1x1x1x128xf32>,
    %13 = math.absf %6 : vector<1x64x128xf32>
    %cst_15 = arith.constant dense<0.000000e+00> : vector<1x128xf32>
    %14 = vector.multi_reduction <add>, %13, %cst_15 [1] : vector<1x64x128xf32> to vector<1x128xf32>
    %15 = vector.shape_cast %14 : vector<1x128xf32> to vector<1x1x128xf32>
    %16 = vector.shape_cast %15 : vector<1x1x128xf32> to vector<1x1x1x128xf32>
    %c0_16 = arith.constant 0 : index
    %c0_17 = arith.constant 0 : index
    %c0_18 = arith.constant 0 : index
    %c0_19 = arith.constant 0 : index
    %17 = vector.load %arg7[%c0_16, %c0_17, %c0_18, %c0_19] : memref<1x1x1x128xf32, #tpu.memory_space<vmem>>, vector<1x1x1x128xf32>
    tpu.vector_store %arg7[%c0_16, %c0_17, %c0_18, %c0_19], %16 {strides = array<i32>} : memref<1x1x1x128xf32, #tpu.memory_space<vmem>>, vector<1x1x1x128xf32>,
    return
  }
  func.func @transform_0(%arg0: i32, %arg1: i32) -> (i32, i32, i32) {
    %c0_i32 = arith.constant 0 : i32
    %c0_i32_0 = arith.constant 0 : i32
    %c0_i32_1 = arith.constant 0 : i32
    return %arg0, %c0_i32, %c0_i32_0 : i32, i32, i32
  }
  func.func @transform_1(%arg0: i32, %arg1: i32) -> (i32, i32, i32) {
    %c0_i32 = arith.constant 0 : i32
    %c0_i32_0 = arith.constant 0 : i32
    %c0_i32_1 = arith.constant 0 : i32
    return %arg0, %c0_i32, %c0_i32_0 : i32, i32, i32
  }
  func.func @transform_2(%arg0: i32, %arg1: i32) -> (i32, i32, i32) {
    %c0_i32 = arith.constant 0 : i32
    %c0_i32_0 = arith.constant 0 : i32
    return %arg0, %arg1, %c0_i32 : i32, i32, i32
  }
  func.func @transform_3(%arg0: i32, %arg1: i32) -> (i32, i32, i32) {
    %c0_i32 = arith.constant 0 : i32
    %c0_i32_0 = arith.constant 0 : i32
    return %arg0, %arg1, %c0_i32 : i32, i32, i32
  }
  func.func @transform_4(%arg0: i32, %arg1: i32) -> (i32, i32, i32, i32) {
    %c0_i32 = arith.constant 0 : i32
    %c0_i32_0 = arith.constant 0 : i32
    %c0_i32_1 = arith.constant 0 : i32
    return %arg0, %arg1, %c0_i32, %c0_i32_0 : i32, i32, i32, i32
  }
  func.func @transform_5(%arg0: i32, %arg1: i32) -> (i32, i32, i32, i32) {
    %c0_i32 = arith.constant 0 : i32
    %c0_i32_0 = arith.constant 0 : i32
    %c0_i32_1 = arith.constant 0 : i32
    return %arg0, %arg1, %c0_i32, %c0_i32_0 : i32, i32, i32, i32
  }
}

</mosaic_0001>

<bundles_post_ra>
// kernel: film_forward.3
= control target key start
LH: loop header
LB: loop body
LE: loop exit
PB: predicated region body
PF: predicated region fallthrough
CT: control target
= control target key end

     0   :  { %s736_s18 = smov 0   ;;  %s738_s19 = smov 0   ;;  %s830_s0 = inlined_call_operand.vmem [shape: f32[2,1,128], index: 0, kind: input, shape index: {}]   ;;  %s831_s1 = inlined_call_operand.vmem [shape: f32[2,1,128], index: 1, kind: input, shape index: {}]   ;;  %s832_s2 = inlined_call_operand.vmem [shape: f32[2,256,128], index: 2, kind: input, shape index: {}]   ;;  %s833_s3 = inlined_call_operand.vmem [shape: f32[2,256,128], index: 3, kind: output, shape index: {0}]   ;;  %s834_s4 = inlined_call_operand.vmem [shape: f32[2,4,1,128], index: 4, kind: output, shape index: {1}]   ;;  %s835_s5 = inlined_call_operand.vmem [shape: f32[2,4,1,128], index: 5, kind: output, shape index: {2}]  }
   0x1   :  { %s740_s20 = smov 0   ;;  %s742_s21 = smov 0  }
   0x2   :  { %s744_s22 = smov 0  }
   0x3 LB: > { %s25_s23 = sadd.s32 1, %s696_s20  ;;  %s28_s24 = sadd.s32 1, %s700_s21  ;;  %s704_s22 = sphi %s744_s22, %s16_s22   ;;  %s700_s21 = sphi %s742_s21, %s839_s21   ;;  %s696_s20 = sphi %s740_s20, %s838_s20   ;;  %s692_s19 = sphi %s738_s19, %s837_s19   ;;  %s688_s18 = sphi %s736_s18, %s836_s18  }
   0x4   : > { %p26_p0 = scmp.ge.s32.totalorder %s25_s23, 4  ;;  %p613_p1 = scmp.ge.s32.totalorder %s704_s22, 1 }
   0x5   : > { %p233_p2 = scmp.lt.s32.totalorder %s704_s22, 9 }
   0x6   : > { %s841_s23 = smov (%p26_p0, %s25_s23), 0  ;;  %s843_s24 = smov (!%p26_p0, %s28_s24), %s700_s21 }
   0x7   : > { %p234_p3 = pnand %p613_p1, %p233_p2  ;;  %p30_p4 = scmp.ge.s32.totalorder %s843_s24, 2 }
   0x8   : > { %p289_p5 = scmp.lt.s32.totalorder (!%p234_p3), %s692_s19, 1  ;;  %s614_s25 = sshll.u32 (!%p234_p3), %s688_s18, 3 }
   0x9   : > { %s845_s24 = smov (%p30_p4, %s843_s24), 0  ;;  %237 = sbr.rel (%p234_p3) target bundleno = 56 (0x38), region = 32 }
   0xa   : > { %p298_p6 = scmp.lt.s32.totalorder (!%p234_p3), %s614_s25, 31  ;;  %p317_p7 = scmp.lt.s32.totalorder (!%p234_p3), %s688_s18, 3 }
  0x10   : > { %s847_s19 = smov (!%p289_p5, %s692_s19), 1  ;;  %s849_s25 = smov (!%p298_p6, %s614_s25), 31 }
  0x11   : > { %s291_s28 = scalar_lea.vmem %s830_s0, %s847_s19  ;;  %s294_s6 = scalar_lea.vmem %s831_s1, %s847_s19 }
  0x12   : > { %s615_s7 = sshll.u32 %s847_s19, 5  ;;  %v622_v0 = vld [vmem:[%s291_s28] ss:$0 sm:$0xff]  ;;  %s851_s18 = smov (!%p317_p7, %s688_s18), 3 }
  0x13   : > { %s301_s8 = sadd.s32 %s615_s7, %s849_s25  ;;  %v623_v1 = vld [vmem:[%s294_s6] ss:$0 sm:$0xff]  ;;  %s620_s16 = sshll.u32 %s847_s19, 2 }
  0x14   : > { %s616_s9 = sshll.u32 %s301_s8, 3  ;;  %s320_s17 = sadd.s32 %s620_s16, %s851_s18 }
  0x15   : > { %s783_s12 = scalar_lea.vmem %s832_s2, %s616_s9  ;;  %s793_s15 = scalar_lea.vmem %s833_s3, %s616_s9 }
  0x16   : > { %v331_v2 = vld [vmem:[%s783_s12] sm:$0xff]  ;;  %v332_v3 = vld [vmem:[%s783_s12 + $0x8] sm:$0xff]  ;;  %v333_v4 = vld [vmem:[%s783_s12 + $0x10] sm:$0xff]  ;;  %s321_s27 = scalar_lea.vmem %s834_s4, %s320_s17  ;;  %s328_s30 = scalar_lea.vmem %s835_s5, %s320_s17 }
  0x17   : > { %v345_v5 = vmul.f32 %v622_v0, %v331_v2  ;;  %v375_v6 = vand.u32 2147483647, %v331_v2  ;;  %v346_v7 = vmul.f32 %v622_v0, %v332_v3  ;;  %v376_v8 = vand.u32 2147483647, %v332_v3  ;;  %v334_v9 = vld [vmem:[%s783_s12 + $0x18] sm:$0xff]  ;;  %v335_v10 = vld [vmem:[%s783_s12 + $0x20] sm:$0xff] }
  0x18   : > { %v347_v11 = vmul.f32 %v622_v0, %v333_v4  ;;  %v377_v12 = vand.u32 2147483647, %v333_v4  ;;  %v348_v13 = vmul.f32 %v622_v0, %v334_v9  ;;  %v378_v14 = vand.u32 2147483647, %v334_v9  ;;  %v336_v15 = vld [vmem:[%s783_s12 + $0x28] sm:$0xff]  ;;  %v337_v24 = vld [vmem:[%s783_s12 + $0x30] sm:$0xff] }
  0x19   : > { %v359_v16 = vadd.f32 %v623_v1, %v345_v5  ;;  %v360_v17 = vadd.f32 %v623_v1, %v346_v7  ;;  %v383_v18 = vadd.f32 %v376_v8, %v375_v6  ;;  %v349_v19 = vmul.f32 %v622_v0, %v335_v10  ;;  %v338_v29 = vld [vmem:[%s783_s12 + $0x38] sm:$0xff] }
  0x1a   : > { %v361_v20 = vadd.f32 %v623_v1, %v347_v11  ;;  %v362_v21 = vadd.f32 %v623_v1, %v348_v13  ;;  %v379_v22 = vand.u32 2147483647, %v335_v10  ;;  %v350_v23 = vmul.f32 %v622_v0, %v336_v15 }
  0x1b   : > { %367 = vst [vmem:[%s793_s15] sm:$0xff] %v359_v16  ;;  %v397_v25 = vand.u32 2147483647, %v359_v16  ;;  %368 = vst [vmem:[%s793_s15 + $0x8] sm:$0xff] %v360_v17  ;;  %v398_v26 = vand.u32 2147483647, %v360_v17  ;;  %v384_v27 = vadd.f32 %v383_v18, %v377_v12  ;;  %v363_v28 = vadd.f32 %v623_v1, %v349_v19 }
  0x1c   : > { %369 = vst [vmem:[%s793_s15 + $0x10] sm:$0xff] %v361_v20  ;;  %v399_v30 = vand.u32 2147483647, %v361_v20  ;;  %370 = vst [vmem:[%s793_s15 + $0x18] sm:$0xff] %v362_v21  ;;  %v400_v31 = vand.u32 2147483647, %v362_v21  ;;  %v364_v32 = vadd.f32 %v623_v1, %v350_v23  ;;  %v351_v36 = vmul.f32 %v622_v0, %v337_v24 }
  0x1d   : > { %v405_v33 = vadd.f32 %v398_v26, %v397_v25  ;;  %v385_v34 = vadd.f32 %v384_v27, %v378_v14  ;;  %371 = vst [vmem:[%s793_s15 + $0x20] sm:$0xff] %v363_v28  ;;  %v380_v35 = vand.u32 2147483647, %v336_v15  ;;  %v401_v37 = vand.u32 2147483647, %v363_v28 }
  0x1e   : > { %372 = vst [vmem:[%s793_s15 + $0x28] sm:$0xff] %v364_v32  ;;  %v352_v38 = vmul.f32 %v622_v0, %v338_v29  ;;  %v365_v41 = vadd.f32 %v623_v1, %v351_v36  ;;  %v381_v42 = vand.u32 2147483647, %v337_v24  ;;  %v402_v46 = vand.u32 2147483647, %v364_v32 }
  0x1f   : > { %v406_v39 = vadd.f32 %v405_v33, %v399_v30  ;;  %v386_v40 = vadd.f32 %v385_v34, %v379_v22  ;;  %v382_v47 = vand.u32 2147483647, %v338_v29 }
  0x20   : > { %v366_v43 = vadd.f32 %v623_v1, %v352_v38  ;;  %373 = vst [vmem:[%s793_s15 + $0x30] sm:$0xff] %v365_v41  ;;  %v403_v50 = vand.u32 2147483647, %v365_v41 }
  0x21   : > { %v407_v44 = vadd.f32 %v406_v39, %v400_v31  ;;  %v387_v45 = vadd.f32 %v386_v40, %v380_v35 }
  0x22   : > { %374 = vst [vmem:[%s793_s15 + $0x38] sm:$0xff] %v366_v43  ;;  %v404_v52 = vand.u32 2147483647, %v366_v43 }
  0x23   : > { %v408_v48 = vadd.f32 %v407_v44, %v401_v37  ;;  %v388_v49 = vadd.f32 %v387_v45, %v381_v42 }
  0x25   : > { %v409_v51 = vadd.f32 %v408_v48, %v402_v46  ;;  %v389_v53 = vadd.f32 %v388_v49, %v382_v47 }
  0x27   : > { %v410_v54 = vadd.f32 %v409_v51, %v403_v50  ;;  %v390_v55 = vrot.slane %v389_v53, 4 }
  0x29   : > { %v411_v56 = vadd.f32 %v410_v54, %v404_v52  ;;  %v391_v57 = vadd.f32 %v390_v55, %v389_v53 }
  0x2b   : > { %v392_v58 = vrot.slane %v391_v57, 2  ;;  %v412_v59 = vrot.slane %v411_v56, 4 }
  0x2d   : > { %v393_v60 = vadd.f32 %v392_v58, %v391_v57  ;;  %v413_v61 = vadd.f32 %v412_v59, %v411_v56 }
  0x2f   : > { %v394_v62 = vrot.slane %v393_v60, 1  ;;  %v414_v63 = vrot.slane %v413_v61, 2 }
  0x31   : > { %v395_v0 = vadd.f32 %v394_v62, %v393_v60  ;;  %v415_v1 = vadd.f32 %v414_v63, %v413_v61 }
  0x33   : > { %396 = vst [vmem:[%s321_s27] sm:$0x1] %v395_v0  ;;  %v416_v2 = vrot.slane %v415_v1, 1 }
  0x35   : > { %v417_v3 = vadd.f32 %v416_v2, %v415_v1 }
  0x37   : > { %418 = vst [vmem:[%s328_s30] sm:$0x1] %v417_v3 }
  0x38 PF: > { %s16_s22 = sadd.s32 1, %s704_s22   ;;  %s836_s18 = smov %s696_s20 }
  0x39   : > { %p13_p8 = scmp.ge.s32.totalorder %s16_s22, 10   ;;  %s837_s19 = smov %s700_s21 }
  0x3a   : > { %s838_s20 = smov %s841_s23  ;;  %s839_s21 = smov %s845_s24 }
  0x3b   :  { %15 = sbr.rel (!%p13_p8) target bundleno = 3 (0x3), region = 92 }

// kernel: film_forward.2
= control target key start
LH: loop header
LB: loop body
LE: loop exit
PB: predicated region body
PF: predicated region fallthrough
CT: control target
= control target key end

     0   :  { %12 = vsyncpa [#allocation3], 0  ;;  %s478_s0 = inlined_call_operand.hbm [shape: f32[2,32], index: 0, kind: input, shape index: {}]   ;;  %s479_s1 = inlined_call_operand.vmem [shape: f32[32,16], index: 1, kind: input, shape index: {}]   ;;  %s480_s2 = inlined_call_operand.hbm [shape: f32[1,16], index: 2, kind: input, shape index: {}]   ;;  %s481_s3 = inlined_call_operand.vmem [shape: f32[32,16], index: 3, kind: input, shape index: {}]   ;;  %s482_s4 = inlined_call_operand.hbm [shape: f32[1,16], index: 4, kind: input, shape index: {}]   ;;  %s483_s5 = inlined_call_operand.vmem [shape: f32[2,16], index: 5, kind: output, shape index: {0}]   ;;  %s484_s6 = inlined_call_operand.vmem [shape: f32[2,16], index: 6, kind: output, shape index: {1}]  }
   0x1   :  { %13 = vsyncpa [#allocation5], 0  ;;  %s371_s21 = smov [#allocation4]   ;;  %s372_s23 = smov [#allocation2]  }
   0x2   :  { %s32_s22 = sshll.u32 %s371_s21, 4  ;;  %s20_s24 = sshll.u32 %s372_s23, 4  ;;  %s33_s22 = int_to_ptr.vmem [resolvable:$true] %s32_s22  ;;  %s21_s24 = int_to_ptr.vmem [resolvable:$true] %s20_s24 }
   0x3   :  { %s301_s27 = scalar_lea.hbm %s480_s2, 16 }
   0x4   :  { %p302_p0 = scmp.ne.s32.totalorder %s480_s2, %s301_s27  ;;  %p305_p1 = scmp.lt.u32.totalorder %s301_s27, %s480_s2 }
   0x6   :  { %p307_p2 = pnand %p305_p1, %p302_p0 }
   0x8   :  { %310 = shalt.err (!%p307_p2)
}
   0x9   :  { %s311_s8 = scalar_lea.vmem %s33_s22, 16  ;;  %s315_s9 = scalar_lea.vmem %s33_s22, 32 }
   0xa   :  { %p312_p3 = scmp.ne.s32.totalorder %s33_s22, %s311_s8  ;;  %p316_p4 = scmp.lt.s32.totalorder %s33_s22, %s33_s22 }
   0xb   :  { %p317_p5 = scmp.lt.s32.totalorder %s315_s9, %s311_s8 }
   0xd   :  { %p318_p6 = por %p317_p5, %p316_p4 }
   0xf   :  { %p319_p7 = pnand %p318_p6, %p312_p3 }
  0x11   :  { %322 = shalt.err (!%p319_p7)
}
  0x12   :  { %35 = dma.hbm_to_vmem [thread:$0]  %s480_s2, 16, %s33_s22, [#allocation5]  }
  0x13   :  { %s323_s14 = scalar_lea.hbm %s478_s0, 32 }
  0x14   :  { %p324_p8 = scmp.ne.s32.totalorder %s478_s0, %s323_s14  ;;  %p327_p9 = scmp.lt.u32.totalorder %s323_s14, %s478_s0 }
  0x16   :  { %p329_p10 = pnand %p327_p9, %p324_p8 }
  0x18   :  { %332 = shalt.err (!%p329_p10)
}
  0x19   :  { %s333_s19 = scalar_lea.vmem %s21_s24, 32  ;;  %p338_p12 = scmp.lt.s32.totalorder %s21_s24, %s21_s24 }
  0x1a   :  { %p334_p11 = scmp.ne.s32.totalorder %s21_s24, %s333_s19  ;;  %p339_p13 = scmp.lt.s32.totalorder %s333_s19, %s333_s19 }
  0x1c   :  { %p340_p0 = por %p339_p13, %p338_p12 }
  0x1e   :  { %p341_p1 = pnand %p340_p0, %p334_p11 }
  0x20   :  { %344 = shalt.err (!%p341_p1)
}
  0x21   :  { %23 = dma.hbm_to_vmem [thread:$0]  %s478_s0, 32, %s21_s24, [#allocation3]  }
  0x22   :  { %s373_s21 = smov [#allocation6]   ;;  %s345_s26 = scalar_lea.hbm %s482_s4, 16 }
  0x23   :  { %s44_s22 = sshll.u32 %s373_s21, 4  ;;  %p346_p2 = scmp.ne.s32.totalorder %s482_s4, %s345_s26  ;;  %s45_s22 = int_to_ptr.vmem [resolvable:$true] %s44_s22 }
  0x24   :  { %p349_p3 = scmp.lt.u32.totalorder %s345_s26, %s482_s4 }
  0x26   :  { %p351_p4 = pnand %p349_p3, %p346_p2 }
  0x28   :  { %354 = shalt.err (!%p351_p4)
}
  0x29   :  { %s355_s7 = scalar_lea.vmem %s45_s22, 16  ;;  %s359_s0 = scalar_lea.vmem %s45_s22, 32 }
  0x2a   :  { %p356_p5 = scmp.ne.s32.totalorder %s45_s22, %s355_s7  ;;  %p360_p6 = scmp.lt.s32.totalorder %s45_s22, %s45_s22 }
  0x2b   :  { %p361_p7 = scmp.lt.s32.totalorder %s359_s0, %s355_s7 }
  0x2d   :  { %p362_p8 = por %p361_p7, %p360_p6 }
  0x2f   :  { %p363_p9 = pnand %p362_p8, %p356_p5 }
  0x31   :  { %366 = shalt.err (!%p363_p9)
}
  0x32   :  { %47 = dma.hbm_to_vmem [thread:$0]  %s482_s4, 16, %s45_s22, [#allocation5]  }
  0x33   :  { %367 = dma.done.wait [#allocation3], 32  }
  0x34   :  { %368 = vsyncadd [#allocation3], 4294967264 }
  0x35   :  { %369 = dma.done.wait [#allocation5], 32  }
  0x36   :  { %370 = vsyncadd [#allocation5], 4294967264  ;;  %v374_v0 = vmov 0.0|0.0   ;;  %vm375_vm0 = vmmov 0   ;;  %v376_v1 = vmov 0.0   ;;  %v58_v2 = vld [vmem:[%s479_s1] sm:$0xff] }
  0x37   :  { %279 = vmatprep.subr.bf16.mxu0 %v374_v0  ;;  %285 = vmatprep.subr.bf16.mxu1 %v374_v0  ;;  %v59_v3 = vld [vmem:[%s479_s1 + $0x8] sm:$0xff]  ;;  %v143_v4 = vld [vmem:[%s481_s3] sm:$0xff]  ;;  %v60_v7 = vld [vmem:[%s479_s1 + $0x10] sm:$0xff]  ;;  %vm69_vm1 = vcmask 261120   ;;  %vm227_vm2 = vcmask 123904  }
  0x38   :  { %265 = vmatprep.mubr.msk.f32.mxu0 %vm375_vm0, %v376_v1  ;;  %276 = vmatprep.mubr.msk.f32.mxu1 %vm375_vm0, %v376_v1  ;;  %v280_v5 = vpack.c.bf16 %v59_v3, %v58_v2  ;;  %v144_v6 = vld [vmem:[%s481_s3 + $0x8] sm:$0xff]  ;;  %v61_v8 = vld [vmem:[%s479_s1 + $0x18] sm:$0xff]  ;;  %v145_v10 = vld [vmem:[%s481_s3 + $0x10] sm:$0xff] }
  0x39   :  { %v286_v9 = vpack.c.bf16 %v144_v6, %v143_v4  ;;  %v146_v11 = vld [vmem:[%s481_s3 + $0x18] sm:$0xff]  ;;  %v283_v12 = vpack.c.bf16 %v61_v8, %v60_v7  ;;  %v57_v14 = vld [vmem:[#allocation2] sm:$0x3]  ;;  %v243_v15 = vld [vmem:[#allocation4] ss:$0 sm:$0xff] }
  0x3a   :  { %281 = vmatpush3.bf16.msra.mxu0 %v280_v5  ;;  %v289_v13 = vpack.c.bf16 %v146_v11, %v145_v10  ;;  %v245_v16 = vld [vmem:[#allocation6] ss:$0 sm:$0xff] }
  0x3b   :  { %287 = vmatpush3.bf16.msra.mxu1 %v286_v9  ;;  %282 = vmatprep.subr.bf16.mxu0 %v374_v0 }
  0x3c   :  { %288 = vmatprep.subr.bf16.mxu1 %v374_v0 }
  0x3e   :  { %284 = vmatpush3.bf16.msra.mxu0 %v283_v12 }
  0x3f   :  { %290 = vmatpush3.bf16.msra.mxu1 %v289_v13 }
  0x41   :  { %266 = vmatmul.mubr.msk.f32.vlgmr.msra.gmra.mrb[0].mxu0 %vm69_vm1, %v57_v14 }
  0x42   :  { %277 = vmatmul.mubr.msk.f32.vlgmr.msra.gmra.mrb[0].mxu1 %vm69_vm1, %v57_v14 }
 0x114   :  { %v139_v17 = vpop.f32.mrb[0].mxu0 }
 0x115   :  { %v140_v18 = vadd.f32 %v243_v15, %v139_v17  ;;  %v220_v19 = vpop.f32.mrb[0].mxu1  ;;  %v267_v20 = vpop.f32.mrb[1].mxu0 }
 0x116   :  { %v221_v21 = vadd.f32 %v245_v16, %v220_v19  ;;  %v278_v22 = vpop.f32.mrb[1].mxu1 }
 0x117   :  { %v224_v23 = vmul.f32 0.0033333334, %v140_v18 }
 0x118   :  { %v229_v24 = vmul.f32 0.0033333334, %v221_v21 }
 0x119   :  { %297 = vtanh.f32 %v224_v23 }
 0x11a   :  { %299 = vtanh.f32 %v229_v24 }
 0x123   :  { %v298_v25 = vpop.eup %297 }
 0x124   :  { %v300_v26 = vpop.eup %299  ;;  %v226_v27 = vmul.f32 300.0, %v298_v25 }
 0x125   :  { %v231_v28 = vmul.f32 300.0, %v300_v26 }
 0x126   :  { %228 = vst.msk [vmem:[%s483_s5] sm:$0x3] %vm227_vm2, %v226_v27 }
 0x127   :  { %232 = vst.msk [vmem:[%s484_s6] sm:$0x3] %vm227_vm2, %v231_v28 }
 0x128   :  { %241 = vsyncpa [#allocation3], 1 }
 0x129   :  { %242 = vsyncpa [#allocation5], 1 }

</bundles_post_ra>
